<compile_context>
chip_gen: v6e
topology: v6e:2x2x1
jax: 0.10.0
libtpu: 0.0.40
codegen_flags: <defaults>
</compile_context>

<pallas_src>
import math

import jax
import jax.numpy as jnp
import numpy as np
from jax.experimental import pallas as pl
from jax.experimental.pallas import tpu as pltpu


def _lora_qkv_kernel(x_ref, wqkv_ref, bqkv_ref, wacat_ref, wbblk_ref, o_ref,
                     h_ref):
    """One (tm, tn) output block of the fused qkv + LoRA projection.

    x_ref     : (tm, C)        token tile (compute dtype); constant across j
    wqkv_ref  : (C, tn)        column block of frozen W_qkv^T (streams over j)
    bqkv_ref  : (1, tn)        column block of frozen qkv bias (f32)
    wacat_ref : (C, 2r_pad)    [Wa_q^T | Wa_v^T | 0-pad], resident
    wbblk_ref : (2r_pad, tn)   column block of scale-folded block-diag B
    o_ref     : (tm, tn)       output block
    h_ref     : (tm, 2r_pad)   f32 scratch: LoRA "A" result, reused across j
    """
    j = pl.program_id(1)
    x = x_ref[...]

    # Tiny LoRA "A" projection: compute once per row tile, reuse for every
    # column block of the same row tile (scratch persists across grid steps;
    # the column axis is the inner, sequential axis).
    @pl.when(j == 0)
    def _():
        h_ref[...] = jnp.dot(x, wacat_ref[...],
                             preferred_element_type=jnp.float32)

    # Frozen qkv projection for this column block (MXU, f32 accumulation).
    acc = jnp.dot(x, wqkv_ref[...], preferred_element_type=jnp.float32)
    acc = acc + bqkv_ref[...]

    # LoRA "B": block-diagonal over the full 3C, so delta columns align 1:1
    # with this qkv column block (the K third hits an all-zero slab -> exact).
    # The (alpha // r) scale is pre-folded into wbblk.
    acc = acc + jnp.dot(h_ref[...].astype(wbblk_ref.dtype), wbblk_ref[...],
                        preferred_element_type=jnp.float32)

    # Single lane-dense store; cast only here (f32 accumulation throughout).
    o_ref[...] = acc.astype(o_ref.dtype)


def _pick_tn(three_c, tn):
    """Column tile: a multiple of 128 that divides 3C (full width fallback)."""
    if tn is not None:
        if three_c % tn != 0:
            raise ValueError(f"tn={tn} must divide 3*dim={three_c}")
        return tn
    for cand in (512, 384, 256, 128):
        if three_c % cand == 0:
            return cand
    return three_c  # dim not a multiple of 128: one full-width column block


def prepare_lora_qkv_weights(w_qkv, b_qkv, w_a_q, w_b_q, w_a_v, w_b_v, *,
                             r, alpha, compute_dtype=jnp.float32):
    """Assemble the frozen / slowly-changing kernel operands ONCE per layer.

    w_qkv : (3C, C) PyTorch Linear layout (out, in);  b_qkv : (3C,)
    w_a_* : (r, C);  w_b_* : (C, r)
    Returns (wqkv_t, bqkv_2d, wa_cat, wb_blk) ready for lora_qkv_prepared().
    """
    three_c, C = w_qkv.shape
    assert three_c == 3 * C
    scale = float(alpha // r)  # PyTorch integer division semantics

    wqkv_t = jnp.transpose(w_qkv).astype(compute_dtype)        # (C, 3C)
    bqkv_2d = b_qkv.reshape(1, three_c).astype(jnp.float32)    # (1, 3C), f32

    # Fuse the two rank-r LoRA chains; pad 2r to a sublane multiple (>= 8).
    # (Padding 2r to 128 would make h lane-dense at ~10% extra MXU pushes on
    #  the B matmul — only worth it if the kernel ends up store/VPU bound.)
    r2 = 2 * r
    r2_pad = max(8, ((r2 + 7) // 8) * 8)
    wa_cat = jnp.zeros((C, r2_pad), compute_dtype)
    wa_cat = wa_cat.at[:, :r].set(jnp.transpose(w_a_q).astype(compute_dtype))
    wa_cat = wa_cat.at[:, r:r2].set(jnp.transpose(w_a_v).astype(compute_dtype))

    # Block-diagonal "B" over the full 3C output: q columns, zero K slab,
    # v columns. The LoRA scale is folded in here (exact integer-valued f32).
    wb_blk = jnp.zeros((r2_pad, three_c), jnp.float32)
    wb_blk = wb_blk.at[:r, :C].set(scale * jnp.transpose(w_b_q).astype(jnp.float32))
    wb_blk = wb_blk.at[r:r2, 2 * C:].set(scale * jnp.transpose(w_b_v).astype(jnp.float32))
    wb_blk = wb_blk.astype(compute_dtype)

    return wqkv_t, bqkv_2d, wa_cat, wb_blk


def lora_qkv_prepared(x, prepared, *, tm=128, tn=None, out_dtype=None):
    """Run the fused qkv+LoRA kernel using pre-assembled weights.

    x   : (B, N, C)
    tm  : token-row tile (multiple of 8; 128 matches all MXU generations and
          keeps v7x's two TensorCores busy even at small B*N).
    tn  : output-column tile (multiple of 128 dividing 3C; auto-chosen).
    """
    wqkv_t, bqkv_2d, wa_cat, wb_blk = prepared
    B, N, C = x.shape
    assert wqkv_t.shape[0] == C
    three_c = wqkv_t.shape[1]
    r2_pad = wa_cat.shape[1]
    compute_dtype = wqkv_t.dtype
    if out_dtype is None:
        out_dtype = x.dtype

    tn = _pick_tn(three_c, tn)
    M = B * N
    num_m = pl.cdiv(M, tm)
    m_pad = num_m * tm
    num_n = three_c // tn

    # Flatten tokens to rows; pad to a tile multiple (real ViT N=197 works).
    x2 = x.reshape(M, C).astype(compute_dtype)
    if m_pad != M:
        x2 = jnp.pad(x2, ((0, m_pad - M), (0, 0)))

    cbytes = jnp.dtype(compute_dtype).itemsize
    obytes = jnp.dtype(out_dtype).itemsize
    cost = pl.CostEstimate(
        flops=(2 * m_pad * C * three_c          # frozen qkv matmul
               + 2 * m_pad * C * r2_pad         # LoRA A (once per row tile)
               + 2 * m_pad * r2_pad * three_c), # LoRA B (per column block)
        transcendentals=0,
        bytes_accessed=(m_pad * C * cbytes                       # x (once)
                        + num_m * C * three_c * cbytes           # W_qkv stream
                        + num_m * (three_c * 4
                                   + r2_pad * three_c * cbytes)  # bias + B
                        + C * r2_pad * cbytes                    # A (resident)
                        + m_pad * three_c * obytes))             # output

    out2 = pl.pallas_call(
        _lora_qkv_kernel,
        out_shape=jax.ShapeDtypeStruct((m_pad, three_c), out_dtype),
        grid_spec=pltpu.PrefetchScalarGridSpec(
            num_scalar_prefetch=0,
            grid=(num_m, num_n),            # rows outer, 3C columns inner
            in_specs=[
                # x tile: constant across j -> not re-fetched per column step.
                pl.BlockSpec((tm, C), lambda i, j: (i, 0)),
                # W_qkv^T: streams one (C, tn) column block per step
                # (double-buffered by the pipeline; hidden under MXU work).
                pl.BlockSpec((C, tn), lambda i, j: (0, j)),
                # bias column block (f32).
                pl.BlockSpec((1, tn), lambda i, j: (0, j)),
                # fused LoRA A: tiny, constant index -> effectively resident.
                pl.BlockSpec((C, r2_pad), lambda i, j: (0, 0)),
                # fused, scale-folded, block-diagonal LoRA B column block.
                pl.BlockSpec((r2_pad, tn), lambda i, j: (0, j)),
            ],
            out_specs=pl.BlockSpec((tm, tn), lambda i, j: (i, j)),
            scratch_shapes=[pltpu.VMEM((tm, r2_pad), jnp.float32)],  # h
        ),
        compiler_params=pltpu.CompilerParams(
            # Row axis parallel (shards across TensorCores on v7x); column
            # axis sequential so the h scratch carries across column blocks.
            dimension_semantics=("parallel", "arbitrary")),
        cost_estimate=cost,
    )(x2, wqkv_t, bqkv_2d, wa_cat, wb_blk)

    return out2[:M].reshape(B, N, three_c)


def lora_qkv(x, w_qkv, b_qkv, w_a_q, w_b_q, w_a_v, w_b_v, *, r, alpha,
             tm=128, tn=None, compute_dtype=None, out_dtype=None):
    """Convenience wrapper: MeLO _LoRA_qkv_timm.forward as one Pallas kernel.

    For per-layer use, call prepare_lora_qkv_weights() once and cache the
    result, then call lora_qkv_prepared() per forward pass.
    """
    if compute_dtype is None:
        compute_dtype = x.dtype
    prepared = prepare_lora_qkv_weights(
        w_qkv, b_qkv, w_a_q, w_b_q, w_a_v, w_b_v,
        r=r, alpha=alpha, compute_dtype=compute_dtype)
    return lora_qkv_prepared(x, prepared, tm=tm, tn=tn, out_dtype=out_dtype)


def lora_qkv_reference(x, w_qkv, b_qkv, w_a_q, w_b_q, w_a_v, w_b_v, *, r, alpha):
    """Pure-JAX reference mirroring _LoRA_qkv_timm.forward exactly."""
    dim = x.shape[-1]
    scale = alpha // r
    qkv = jnp.einsum("bnc,oc->bno", x, w_qkv) + b_qkv
    new_q = jnp.einsum("bnr,or->bno", jnp.einsum("bnc,rc->bnr", x, w_a_q), w_b_q)
    new_v = jnp.einsum("bnr,or->bno", jnp.einsum("bnc,rc->bnr", x, w_a_v), w_b_v)
    qkv = qkv.at[:, :, :dim].add(scale * new_q)
    qkv = qkv.at[:, :, -dim:].add(scale * new_v)
    return qkv


def kaiming_uniform(key, shape, a=math.sqrt(5)):
    """nn.init.kaiming_uniform_ for a Linear weight of shape (out, in)."""
    fan_in = shape[1]
    gain = math.sqrt(2.0 / (1.0 + a * a))
    bound = gain * math.sqrt(3.0 / fan_in)
    return jax.random.uniform(key, shape, jnp.float32, minval=-bound, maxval=bound)


if __name__ == "__main__":
    # ViT-style token count (197 = cls + 14x14) exercises the row-padding
    # path; dim=128 keeps everything lane-aligned at small scale.
    B, N, dim = 2, 197, 128
    r, alpha = 4, 8

    key = jax.random.PRNGKey(0)
    kx, kw, kb, ka_q, kb_q, ka_v, kb_v = jax.random.split(key, 7)

    x = jax.random.normal(kx, (B, N, dim), jnp.float32)

    # Frozen qkv Linear (dim -> 3*dim), PyTorch (out, in) layout.
    w_qkv = jax.random.normal(kw, (3 * dim, dim), jnp.float32) * 0.05
    b_qkv = jax.random.normal(kb, (3 * dim,), jnp.float32) * 0.05

    # LoRA A weights: kaiming_uniform (as in MeLO.reset_parameters).
    w_a_q = kaiming_uniform(ka_q, (r, dim))
    w_a_v = kaiming_uniform(ka_v, (r, dim))
    # LoRA B weights: the module inits these to zero; use small nonzero values
    # here so the LoRA branch of the kernel is actually exercised.
    w_b_q = jax.random.normal(kb_q, (dim, r), jnp.float32) * 0.02
    w_b_v = jax.random.normal(kb_v, (dim, r), jnp.float32) * 0.02

    ref = lora_qkv_reference(x, w_qkv, b_qkv, w_a_q, w_b_q, w_a_v, w_b_v,
                             r=r, alpha=alpha)

    # f32 path with tn=128 -> 3 column blocks per row tile (exercises the
    # column-blocked epilogue and the h-scratch reuse). Tight check.
    out = lora_qkv(x, w_qkv, b_qkv, w_a_q, w_b_q, w_a_v, w_b_v,
                   r=r, alpha=alpha, tm=128, tn=128)
    out = jax.block_until_ready(out)
    np.testing.assert_allclose(np.asarray(out), np.asarray(ref),
                               rtol=1e-4, atol=1e-4)

    # bf16 compute + bf16 output (v6e throughput mode), prepared weights
    # cached outside the forward call. Loose sanity check.
    prepared_bf16 = prepare_lora_qkv_weights(
        w_qkv, b_qkv, w_a_q, w_b_q, w_a_v, w_b_v,
        r=r, alpha=alpha, compute_dtype=jnp.bfloat16)
    out_bf16 = lora_qkv_prepared(x, prepared_bf16, tm=128,
                                 out_dtype=jnp.bfloat16)
    out_bf16 = jax.block_until_ready(out_bf16)
    np.testing.assert_allclose(np.asarray(out_bf16).astype(np.float32),
                               np.asarray(ref), rtol=1e-1, atol=1e-1)

    print("KERNEL_OK")
</pallas_src>

<mosaic_0001>
module attributes {stable_mosaic.version = 11 : i64} {
  func.func @_lora_qkv_kernel(%arg0: i32, %arg1: i32, %arg2: memref<128x128xf32, #tpu.memory_space<vmem>>, %arg3: memref<128x128xf32, #tpu.memory_space<vmem>>, %arg4: memref<1x128xf32, #tpu.memory_space<vmem>>, %arg5: memref<128x8xf32, #tpu.memory_space<vmem>>, %arg6: memref<8x128xf32, #tpu.memory_space<vmem>>, %arg7: memref<128x128xf32, #tpu.memory_space<vmem>>, %arg8: memref<128x8xf32, #tpu.memory_space<vmem>>) attributes {dimension_semantics = [#tpu.dimension_semantics<parallel>, #tpu.dimension_semantics<arbitrary>], iteration_bounds = array<i64: 4, 3>, scalar_prefetch = 0 : i64, scratch_operands = 1 : i64, tpu.core_type = #tpu.core_type<tc>, window_params = [{transform_indices = @transform_0, window_bounds = array<i64: 128, 128>}, {transform_indices = @transform_1, window_bounds = array<i64: 128, 128>}, {transform_indices = @transform_2, window_bounds = array<i64: 1, 128>}, {pipeline_mode = #tpu.pipeline_mode<synchronous>, transform_indices = @transform_3, window_bounds = array<i64: 128, 8>}, {transform_indices = @transform_4, window_bounds = array<i64: 8, 128>}, {transform_indices = @transform_5, window_bounds = array<i64: 128, 128>}]} {
    %c0 = arith.constant 0 : index
    %c0_0 = arith.constant 0 : index
    %0 = vector.load %arg2[%c0, %c0_0] : memref<128x128xf32, #tpu.memory_space<vmem>>, vector<128x128xf32>
    %c0_i32 = arith.constant 0 : i32
    %1 = arith.cmpi eq, %arg1, %c0_i32 : i32
    %2 = arith.extui %1 : i1 to i32
    %c0_i32_1 = arith.constant 0 : i32
    %3 = arith.cmpi ne, %2, %c0_i32_1 : i32
    scf.if %3 {
      %c0_13 = arith.constant 0 : index
      %c0_14 = arith.constant 0 : index
      %14 = vector.load %arg5[%c0_13, %c0_14] : memref<128x8xf32, #tpu.memory_space<vmem>>, vector<128x8xf32>
      %cst_15 = arith.constant dense<0.000000e+00> : vector<128x8xf32>
      %15 = tpu.matmul %0, %14, %cst_15 {dimension_numbers = #tpu.dot_dimension_numbers<[1], [0], [0], [1], [0, 0, 1, 1], [], []>} : vector<128x128xf32>, vector<128x8xf32>, vector<128x8xf32> -> vector<128x8xf32>
      %c0_16 = arith.constant 0 : index
      %c0_17 = arith.constant 0 : index
      %16 = vector.load %arg8[%c0_16, %c0_17] : memref<128x8xf32, #tpu.memory_space<vmem>>, vector<128x8xf32>
      tpu.vector_store %arg8[%c0_16, %c0_17], %15 {strides = array<i32>} : memref<128x8xf32, #tpu.memory_space<vmem>>, vector<128x8xf32>,
    } else {
    }
    %c0_2 = arith.constant 0 : index
    %c0_3 = arith.constant 0 : index
    %4 = vector.load %arg3[%c0_2, %c0_3] : memref<128x128xf32, #tpu.memory_space<vmem>>, vector<128x128xf32>
    %cst = arith.constant dense<0.000000e+00> : vector<128x128xf32>
    %5 = tpu.matmul %0, %4, %cst {dimension_numbers = #tpu.dot_dimension_numbers<[1], [0], [0], [1], [0, 0, 1, 1], [], []>} : vector<128x128xf32>, vector<128x128xf32>, vector<128x128xf32> -> vector<128x128xf32>
    %c0_4 = arith.constant 0 : index
    %c0_5 = arith.constant 0 : index
    %6 = vector.load %arg4[%c0_4, %c0_5] : memref<1x128xf32, #tpu.memory_space<vmem>>, vector<1x128xf32>
    %7 = vector.broadcast %6 : vector<1x128xf32> to vector<128x128xf32>
    %8 = arith.addf %5, %7 : vector<128x128xf32>
    %c0_6 = arith.constant 0 : index
    %c0_7 = arith.constant 0 : index
    %9 = vector.load %arg8[%c0_6, %c0_7] : memref<128x8xf32, #tpu.memory_space<vmem>>, vector<128x8xf32>
    %c0_8 = arith.constant 0 : index
    %c0_9 = arith.constant 0 : index
    %10 = vector.load %arg6[%c0_8, %c0_9] : memref<8x128xf32, #tpu.memory_space<vmem>>, vector<8x128xf32>
    %cst_10 = arith.constant dense<0.000000e+00> : vector<128x128xf32>
    %11 = tpu.matmul %9, %10, %cst_10 {dimension_numbers = #tpu.dot_dimension_numbers<[1], [0], [0], [1], [0, 0, 1, 1], [], []>} : vector<128x8xf32>, vector<8x128xf32>, vector<128x128xf32> -> vector<128x128xf32>
    %12 = arith.addf %8, %11 : vector<128x128xf32>
    %c0_11 = arith.constant 0 : index
    %c0_12 = arith.constant 0 : index
    %13 = vector.load %arg7[%c0_11, %c0_12] : memref<128x128xf32, #tpu.memory_space<vmem>>, vector<128x128xf32>
    tpu.vector_store %arg7[%c0_11, %c0_12], %12 {strides = array<i32>} : memref<128x128xf32, #tpu.memory_space<vmem>>, vector<128x128xf32>,
    return
  }
  func.func @transform_0(%arg0: i32, %arg1: i32) -> (i32, i32) {
    %c0_i32 = arith.constant 0 : i32
    %c0_i32_0 = arith.constant 0 : i32
    return %arg0, %c0_i32 : i32, i32
  }
  func.func @transform_1(%arg0: i32, %arg1: i32) -> (i32, i32) {
    %c0_i32 = arith.constant 0 : i32
    %c0_i32_0 = arith.constant 0 : i32
    return %c0_i32, %arg1 : i32, i32
  }
  func.func @transform_2(%arg0: i32, %arg1: i32) -> (i32, i32) {
    %c0_i32 = arith.constant 0 : i32
    %c0_i32_0 = arith.constant 0 : i32
    return %c0_i32, %arg1 : i32, i32
  }
  func.func @transform_3(%arg0: i32, %arg1: i32) -> (i32, i32) {
    %c0_i32 = arith.constant 0 : i32
    %c0_i32_0 = arith.constant 0 : i32
    %c0_i32_1 = arith.constant 0 : i32
    return %c0_i32, %c0_i32_0 : i32, i32
  }
  func.func @transform_4(%arg0: i32, %arg1: i32) -> (i32, i32) {
    %c0_i32 = arith.constant 0 : i32
    %c0_i32_0 = arith.constant 0 : i32
    return %c0_i32, %arg1 : i32, i32
  }
  func.func @transform_5(%arg0: i32, %arg1: i32) -> (i32, i32) {
    %c0_i32 = arith.constant 0 : i32
    return %arg0, %arg1 : i32, i32
  }
}

</mosaic_0001>

<bundles_post_ra>
// kernel: tpu_custom_call.1
= control target key start
LH: loop header
LB: loop body
LE: loop exit
PB: predicated region body
PF: predicated region fallthrough
CT: control target
= control target key end

     0   :  { %s2287_s0 = inlined_call_operand.hbm [shape: f32[512,128], index: 0, kind: input, shape index: {}]   ;;  %s2288_s1 = inlined_call_operand.hbm [shape: f32[128,384], index: 1, kind: input, shape index: {}]   ;;  %s2289_s2 = inlined_call_operand.vmem [shape: f32[1,384], index: 2, kind: input, shape index: {}]   ;;  %s2290_s3 = inlined_call_operand.vmem [shape: f32[128,8], index: 3, kind: input, shape index: {}]   ;;  %s2291_s4 = inlined_call_operand.vmem [shape: f32[8,384], index: 4, kind: input, shape index: {}]   ;;  %s2292_s5 = inlined_call_operand.hbm [shape: f32[512,384], index: 5, kind: output, shape index: {}]  }
   0x1   :  { %2303 = sst [smem:[#allocation18_spill]] %s2287_s0 }
   0x2   :  { %2304 = sst [smem:[#allocation19_spill]] %s2289_s2 }
   0x3   :  { %2305 = sst [smem:[#allocation20_spill]] %s2290_s3 }
   0x4   :  { %2306 = sst [smem:[#allocation21_spill]] %s2291_s4 }
   0x5   :  { %2307 = sst [smem:[#allocation22_spill]] %s2292_s5 }
   0x6   :  { %10 = vsyncpa [#allocation4], 0 }
   0x7   :  { %12 = vsyncpa [#allocation4 + $0x1], 0 }
   0x8   :  { %13 = vsyncpa [#allocation7], 0 }
   0x9   :  { %15 = vsyncpa [#allocation7 + $0x1], 0 }
   0xa   :  { %16 = vsyncpa [#allocation5], 0 }
   0xb   :  { %18 = vsyncpa [#allocation5 + $0x1], 0  ;;  %s1757_s18 = smov 0   ;;  %s1759_s19 = smov 0  }
   0xc   :  { %s1761_s20 = smov 0   ;;  %s1763_s21 = smov 0  }
   0xd   :  { %s1765_s22 = smov 0   ;;  %s1767_s23 = smov 0  }
   0xe   :  { %s1769_s24 = smov 0   ;;  %s1771_s25 = smov 0  }
   0xf   :  { %s1773_s26 = smov 0   ;;  %s1775_s27 = smov 0  }
  0x10   :  { %s1777_s28 = smov 0   ;;  %s1779_s29 = smov 0  }
  0x11   :  { %s1781_s30 = smov 0   ;;  %s1783_s6 = smov 0  }
  0x12 LB: > { %2308 = sst [smem:[#allocation12_spill]] %s1704_s28  ;;  %s1084_s7 = sadd.s32 4294967295, %s1716_s6   ;;  %s1716_s6 = sphi %s1783_s6, %s24_s6   ;;  %s1712_s30 = sphi %s1781_s30, %s2343_s30   ;;  %s1708_s29 = sphi %s1779_s29, %s2354_s29   ;;  %s1704_s28 = sphi %s1777_s28, %s2341_s28   ;;  %s1700_s27 = sphi %s1775_s27, %s2353_s27   ;;  %s1696_s26 = sphi %s1773_s26, %s2352_s26   ;;  %s1692_s25 = sphi %s1771_s25, %s2351_s25   ;;  %s1688_s24 = sphi %s1769_s24, %s2350_s24   ;;  %s1684_s23 = sphi %s1767_s23, %s2349_s23   ;;  %s1680_s22 = sphi %s1765_s22, %s2348_s22   ;;  %s1676_s21 = sphi %s1763_s21, %s2347_s21   ;;  %s1672_s20 = sphi %s1761_s20, %s2346_s20   ;;  %s1668_s19 = sphi %s1759_s19, %s2345_s19   ;;  %s1664_s18 = sphi %s1757_s18, %s2344_s18  }
  0x13   : > { %2309 = sst [smem:[#allocation13_spill]] %s1712_s30  ;;  %p50_p0 = scmp.ne.s32.totalorder %s1696_s26, %s1692_s25 }
  0x14   : > { %p51_p1 = scmp.eq.s32.totalorder %s1716_s6, 0  ;;  %p56_p2 = scmp.ne.s32.totalorder %s1692_s25, %s1688_s24 }
  0x15   : > { %p1832_p3 = scmp.eq.s32.totalorder %s1084_s7, 0  ;;  %p1836_p4 = scmp.eq.s32.totalorder %s1084_s7, 11 }
  0x16   : > { %p52_p5 = por %p51_p1, %p50_p0  ;;  %p1392_p7 = scmp.lt.s32.totalorder %s1716_s6, 12 }
  0x17   : > { %p1844_p6 = por %p1832_p3, %p56_p2  ;;  %s210_s13 = sand.u32 1, %s1696_s26  }
  0x18   : > { %s1122_s14 = sshll.u32 %s1712_s30, 11  ;;  %s1088_s15 = sshll.u32 %s210_s13, 7 }
  0x19   : > { %s2313_s0 = sld [smem:[#allocation18_spill]]  ;;  %s214_s9 = scalar_lea.vmem [#allocation3], %s1088_s15 }
  0x1a   : > { %s221_s7 = sshll.u32 %s214_s9, 4  ;;  %p1856_p8 = pnand %p1392_p7, %p52_p5  ;;  %s222_s7 = int_to_ptr.vmem [resolvable:$true] %s221_s7 }
  0x1b   : > { %s211_s5 = scalar_lea.sflag [#allocation4], %s210_s13  ;;  %s1525_s28 = scalar_lea.vmem %s222_s7, 2048 }
  0x1c   : > { %p1514_p9 = pneg %p1856_p8  ;;  %p1526_p10 = scmp.ne.s32.totalorder %s222_s7, %s1525_s28 }
  0x1d   : > { %s1718_s3 = smov [#allocation3]  }
  0x1e   : > { %p1528_p11 = pnand %p1526_p10, %p1514_p9  ;;  %s1530_s4 = sshll.u32 %s1718_s3, 4  ;;  %s1531_s4 = int_to_ptr.vmem [resolvable:$false] %s1530_s4 }
  0x1f   : > { %s220_s24 = scalar_lea.hbm %s2313_s0, %s1122_s14  ;;  %s1532_s14 = scalar_lea.vmem %s1531_s4, 4096 }
  0x20   : > { %p1529_p12 = pneg %p1528_p11  ;;  %p1533_p13 = scmp.lt.s32.totalorder %s222_s7, %s1531_s4 }
  0x21   : > { %p1534_p0 = scmp.lt.s32.totalorder %s1532_s14, %s1525_s28 }
  0x23   : > { %p1535_p2 = por %p1534_p0, %p1533_p13 }
  0x25   : > { %p1536_p5 = pnand %p1535_p2, %p1529_p12 }
  0x27   : > { %1539 = shalt.err (!%p1536_p5)
}
  0x28   : > { %s2295_s9 = smov 128   ;;  %s2296_s3 = smov 8  }
  0x29   : > { %1384 = dma.hbm_to_vmem [thread:$0]  (!%p1856_p8), %s220_s24, 2048, %s222_s7, %s211_s5, %s2295_s9, %s2295_s9, %s2296_s3  }
  0x2a   : > { %p1093_p9 = scmp.ge.s32.totalorder %s1716_s6, 1  ;;  %p262_p10 = scmp.lt.s32.totalorder %s1716_s6, 13 }
  0x2b   : > { %s1085_s28 = sadd.s32 4294967294, %s1716_s6   ;;  %s33_s13 = sadd.s32 1, %s1708_s29 }
  0x2c   : > { %p1869_p11 = pnand %p1093_p9, %p262_p10  ;;  %s69_s15 = sadd.s32 1, %s1684_s23 }
  0x2d   : > { %p34_p12 = scmp.ge.s32.totalorder %s33_s13, 3  ;;  %p76_p13 = scmp.ne.s32.totalorder %s1684_s23, %s1680_s22 }
  0x2e   : > { %p82_p0 = scmp.ne.s32.totalorder %s1680_s22, %s1676_s21  ;;  %s170_s8 = sadd.s32 1, %s1672_s20 }
  0x2f   : > { %s2356_s13 = smov (%p34_p12, %s33_s13), 0  ;;  %s2317_s5 = sadd.s32 1, %s1712_s30 }
  0x30   : > { %2316 = sst [smem:[#allocation14_spill]] %s2356_s13  ;;  %s2358_s5 = smov (!%p34_p12, %s2317_s5), %s1712_s30 }
  0x31   : > { %s66_s16 = ssub.s32 %s1708_s29, %s2356_s13  ;;  %p1890_p8 = por %p76_p13, %p51_p1 }
  0x32   : > { %p38_p2 = scmp.ge.s32.totalorder %s2358_s5, 4  ;;  %p67_p5 = scmp.eq.s32.totalorder %s66_s16, 0 }
  0x33   : > { %p1896_p9 = por %p82_p0, %p1832_p3  ;;  %p180_p10 = scmp.ne.s32.totalorder %s1672_s20, %s1668_s19 }
  0x34   : > { %s2360_s5 = smov (%p38_p2, %s2358_s5), 0  ;;  %p186_p13 = scmp.ne.s32.totalorder %s1668_s19, %s1664_s18 }
  0x35   : > { %2320 = sst [smem:[#allocation15_spill]] %s2360_s5  ;;  %s40_s7 = ssub.s32 %s1712_s30, %s2360_s5 }
  0x36   : > { %s1905_s24 = scalar_select %p67_p5, %s1684_s23, %s69_s15  }
  0x37   : > { %p1911_p1 = por %p1836_p4, %p180_p10  ;;  %p41_p12 = scmp.eq.s32.totalorder %s40_s7, 0 }
  0x38   : > { %2321 = sst [smem:[#allocation16_spill]] %s1905_s24  ;;  %s167_s10 = sor.u32 %s66_s16, %s40_s7 }
  0x39   : > { %s2322_s14 = scalar_select %p1911_p1, 1, 0 }
  0x3a   : > { %p168_p3 = scmp.eq.s32.totalorder %s167_s10, 0  ;;  %s2324_s9 = sadd.s32 1, %s1696_s26 }
  0x3b   : > { %2323 = sst [smem:[#allocation17_spill]] %s2322_s14  ;;  %p187_p0 = scmp.eq.s32.totalorder %s1085_s28, 11 }
  0x3c   : > { %s1920_s3 = scalar_select %p41_p12, %s1696_s26, %s2324_s9  }
  0x3d   : > { %s1923_s0 = scalar_select %p168_p3, %s1672_s20, %s170_s8  }
  0x3e   : > { %s231_s15 = sand.u32 1, %s1684_s23   ;;  %p1926_p2 = por %p187_p0, %p186_p13 }
  0x3f   : > { %s1091_s13 = sshll.u32 %s231_s15, 7  ;;  %s1092_s5 = sshll.u32 %s1708_s29, 7 }
  0x40   : > { %s2325_s11 = scalar_select %p1926_p2, 1, 0 }
  0x41   : > { %s235_s30 = scalar_lea.vmem [#allocation6], %s1091_s13  ;;  %s240_s16 = scalar_lea.hbm %s2288_s1, %s1092_s5 }
  0x42   : > { %s241_s24 = sshll.u32 %s235_s30, 4  ;;  %p1938_p4 = pnand %p1392_p7, %p1890_p8  ;;  %s242_s24 = int_to_ptr.vmem [resolvable:$true] %s241_s24 }
  0x43   : > { %s232_s28 = scalar_lea.sflag [#allocation7], %s231_s15  ;;  %s1553_s8 = scalar_lea.vmem %s242_s24, 2048 }
  0x44   : > { %p1542_p5 = pneg %p1938_p4  ;;  %p1554_p10 = scmp.ne.s32.totalorder %s242_s24, %s1553_s8 }
  0x45   : > { %s1721_s30 = smov [#allocation6]  }
  0x46   : > { %p1556_p12 = pnand %p1554_p10, %p1542_p5  ;;  %s1558_s13 = sshll.u32 %s1721_s30, 4  ;;  %s1559_s13 = int_to_ptr.vmem [resolvable:$false] %s1558_s13 }
  0x47   : > { %s1560_s2 = scalar_lea.vmem %s1559_s13, 4096  ;;  %p1561_p13 = scmp.lt.s32.totalorder %s242_s24, %s1559_s13 }
  0x48   : > { %p1557_p3 = pneg %p1556_p12  ;;  %p1562_p0 = scmp.lt.s32.totalorder %s1560_s2, %s1553_s8 }
  0x4a   : > { %p1563_p2 = por %p1562_p0, %p1561_p13 }
  0x4c   : > { %p1564_p1 = pnand %p1563_p2, %p1557_p3 }
  0x4e   : > { %1567 = shalt.err (!%p1564_p1)
}
  0x4f   : > { %s1722_s5 = smov 384   ;;  %s2327_s17 = smov 8  }
  0x50   : > { %s2328_s7 = smov 128   ;;  %266 = sbr.rel (%p1869_p11) target bundleno = 617 (0x269), region = 40 }
  0x51   : > { %1387 = dma.hbm_to_vmem [thread:$0]  (!%p1938_p4), %s240_s16, 2048, %s242_s24, %s232_s28, %s1722_s5, %s2328_s7, %s2327_s17  }
  0x52   : > { %s268_s14 = sand.u32 (!%p1869_p11), 1, %s1692_s25  }
  0x53   : > { %s1094_s10 = sshll.u32 (!%p1869_p11), %s268_s14, 7  ;;  %s269_s15 = scalar_lea.sflag (!%p1869_p11), [#allocation4], %s268_s14 }
  0x54   : > { %s1951_s30 = scalar_lea.vmem (!%p1869_p11), [#allocation3], %s1094_s10 }
  0x55   : > { %1651 = dma.done.wait (%p1844_p6), %s269_s15, 2048  }
  0x56   : > { %1653 = vsyncadd (%p1844_p6), %s269_s15, 4294965248  ;;  %s277_s9 = sand.u32 1, %s1680_s22  }
  0x57   : > { %s1095_s8 = sshll.u32 %s277_s9, 7  ;;  %s278_s24 = scalar_lea.sflag [#allocation7], %s277_s9 }
  0x58   : > { %s1958_s16 = scalar_lea.vmem [#allocation6], %s1095_s8 }
  0x59   : > { %1655 = dma.done.wait (%p1896_p9), %s278_s24, 2048  }
  0x5a   : > { %1657 = vsyncadd (%p1896_p9), %s278_s24, 4294965248  ;;  %s317_s12 = sand.u32 1, %s1668_s19   ;;  %p321_p6 = scmp.lt.s32.totalorder %s1700_s27, 2  ;;  %v1982_v0 = vld [vmem:[%s1951_s30] sm:$0xff]  ;;  %v1985_v1 = vld [vmem:[%s1951_s30 + $0x8] sm:$0xff] }
  0x5b   : > { %s1096_s4 = sshll.u32 %s317_s12, 7  ;;  %s2329_s2 = sld [smem:[#allocation19_spill]]  ;;  %v1988_v2 = vld [vmem:[%s1951_s30 + $0x10] sm:$0xff]  ;;  %v1991_v3 = vld [vmem:[%s1951_s30 + $0x18] sm:$0xff]  ;;  %v1994_v4 = vld [vmem:[%s1951_s30 + $0x20] sm:$0xff] }
  0x5c   : > { %s1969_s21 = scalar_select %p321_p6, %s1700_s27, 2  ;;  %v1997_v5 = vld [vmem:[%s1951_s30 + $0x28] sm:$0xff]  ;;  %v2000_v6 = vld [vmem:[%s1951_s30 + $0x30] sm:$0xff]  ;;  %v2003_v7 = vld [vmem:[%s1951_s30 + $0x38] sm:$0xff] }
  0x5d   : > { %s2330_s10 = sld [smem:[#allocation21_spill]]  ;;  %v2006_v8 = vld [vmem:[%s1951_s30 + $0x40] sm:$0xff]  ;;  %v2009_v9 = vld [vmem:[%s1951_s30 + $0x48] sm:$0xff]  ;;  %v2012_v10 = vld [vmem:[%s1951_s30 + $0x50] sm:$0xff]  ;;  %s2029_s9 = scalar_lea.vmem [#allocation8], %s1096_s4 }
  0x5e   : > { %s1097_s17 = sshll.u32 %s1969_s21, 3  ;;  %v2015_v11 = vld [vmem:[%s1951_s30 + $0x58] sm:$0xff]  ;;  %v2018_v12 = vld [vmem:[%s1951_s30 + $0x60] sm:$0xff]  ;;  %v2021_v13 = vld [vmem:[%s1951_s30 + $0x68] sm:$0xff]  ;;  %p1098_p7 = scmp.ne.s32.totalorder %s1700_s27, 0 }
  0x5f   : > { %v2024_v14 = vld [vmem:[%s1951_s30 + $0x70] sm:$0xff]  ;;  %v2027_v15 = vld [vmem:[%s1951_s30 + $0x78] sm:$0xff]  ;;  %s2331_s28 = sld [smem:[#allocation20_spill]] (!%p1098_p7) }
  0x60   : > { %348 = sbr.rel (%p1098_p7) target bundleno = 342 (0x156), region = 52 }
  0x61   : > { %s323_s5 = scalar_lea.vmem %s2329_s2, %s1969_s21 }
  0x63   : > { %s1979_s15 = scalar_lea.vmem %s2330_s10, %s1097_s17 }
  0x65   : > { %s2332_s13 = smov %s2331_s28  ;;  %v364_v16 = vld [vmem:[%s2331_s28 + $0x78] sm:$0xff]  ;;  %1236 = vmatprep.mubr.f32.mxu0 %v1982_v0  ;;  %1248 = vmatprep.mubr.f32.mxu1 %v2006_v8  ;;  %vm510_vm0 = vcmask 64512  }
  0x66   : > { %v363_v17 = vld [vmem:[%s2332_s13 + $0x70] sm:$0xff]  ;;  %1204 = vmatprep.subr.mxu0 %v364_v16  ;;  %1342 = vmatprep.subr.mxu1 %v364_v16  ;;  %v362_v18 = vld [vmem:[%s2332_s13 + $0x68] sm:$0xff]  ;;  %v361_v19 = vld [vmem:[%s2332_s13 + $0x60] sm:$0xff] }
  0x67   : > { %1205 = vmatpush3.msra.mxu0 %v364_v16  ;;  %1358 = vmatpush3.msra.mxu1 %v364_v16  ;;  %v360_v20 = vld [vmem:[%s2332_s13 + $0x58] sm:$0xff]  ;;  %v359_v21 = vld [vmem:[%s2332_s13 + $0x50] sm:$0xff]  ;;  %v358_v22 = vld [vmem:[%s2332_s13 + $0x48] sm:$0xff] }
  0x68   : > { %1206 = vmatprep.subr.mxu0 %v363_v17  ;;  %1343 = vmatprep.subr.mxu1 %v363_v17  ;;  %v357_v23 = vld [vmem:[%s2332_s13 + $0x40] sm:$0xff]  ;;  %v356_v24 = vld [vmem:[%s2332_s13 + $0x38] sm:$0xff]  ;;  %v355_v25 = vld [vmem:[%s2332_s13 + $0x30] sm:$0xff] }
  0x69   : > { %1207 = vmatpush3.msra.mxu0 %v363_v17  ;;  %1359 = vmatpush3.msra.mxu1 %v363_v17  ;;  %v354_v26 = vld [vmem:[%s2332_s13 + $0x28] sm:$0xff]  ;;  %v353_v27 = vld [vmem:[%s2332_s13 + $0x20] sm:$0xff]  ;;  %v352_v28 = vld [vmem:[%s2332_s13 + $0x18] sm:$0xff] }
  0x6a   : > { %1208 = vmatprep.subr.mxu0 %v362_v18  ;;  %1344 = vmatprep.subr.mxu1 %v362_v18  ;;  %v351_v29 = vld [vmem:[%s2332_s13 + $0x10] sm:$0xff]  ;;  %v350_v30 = vld [vmem:[%s2332_s13 + $0x8] sm:$0xff]  ;;  %v349_v31 = vld [vmem:[%s2332_s13] sm:$0xff] }
  0x6b   : > { %1209 = vmatpush3.msra.mxu0 %v362_v18  ;;  %1360 = vmatpush3.msra.mxu1 %v362_v18 }
  0x6c   : > { %1210 = vmatprep.subr.mxu0 %v361_v19  ;;  %1345 = vmatprep.subr.mxu1 %v361_v19 }
  0x6d   : > { %1211 = vmatpush3.msra.mxu0 %v361_v19  ;;  %1361 = vmatpush3.msra.mxu1 %v361_v19 }
  0x6e   : > { %1212 = vmatprep.subr.mxu0 %v360_v20  ;;  %1346 = vmatprep.subr.mxu1 %v360_v20 }
  0x6f   : > { %1213 = vmatpush3.msra.mxu0 %v360_v20  ;;  %1362 = vmatpush3.msra.mxu1 %v360_v20 }
  0x70   : > { %1214 = vmatprep.subr.mxu0 %v359_v21  ;;  %1347 = vmatprep.subr.mxu1 %v359_v21 }
  0x71   : > { %1215 = vmatpush3.msra.mxu0 %v359_v21  ;;  %1363 = vmatpush3.msra.mxu1 %v359_v21 }
  0x72   : > { %1216 = vmatprep.subr.mxu0 %v358_v22  ;;  %1348 = vmatprep.subr.mxu1 %v358_v22 }
  0x73   : > { %1217 = vmatpush3.msra.mxu0 %v358_v22  ;;  %1364 = vmatpush3.msra.mxu1 %v358_v22 }
  0x74   : > { %1218 = vmatprep.subr.mxu0 %v357_v23  ;;  %1349 = vmatprep.subr.mxu1 %v357_v23 }
  0x75   : > { %1219 = vmatpush3.msra.mxu0 %v357_v23  ;;  %1365 = vmatpush3.msra.mxu1 %v357_v23 }
  0x76   : > { %1220 = vmatprep.subr.mxu0 %v356_v24  ;;  %1350 = vmatprep.subr.mxu1 %v356_v24 }
  0x77   : > { %1221 = vmatpush3.msra.mxu0 %v356_v24  ;;  %1366 = vmatpush3.msra.mxu1 %v356_v24 }
  0x78   : > { %1222 = vmatprep.subr.mxu0 %v355_v25  ;;  %1351 = vmatprep.subr.mxu1 %v355_v25 }
  0x79   : > { %1223 = vmatpush3.msra.mxu0 %v355_v25  ;;  %1367 = vmatpush3.msra.mxu1 %v355_v25 }
  0x7a   : > { %1224 = vmatprep.subr.mxu0 %v354_v26  ;;  %1352 = vmatprep.subr.mxu1 %v354_v26 }
  0x7b   : > { %1225 = vmatpush3.msra.mxu0 %v354_v26  ;;  %1368 = vmatpush3.msra.mxu1 %v354_v26 }
  0x7c   : > { %1226 = vmatprep.subr.mxu0 %v353_v27  ;;  %1353 = vmatprep.subr.mxu1 %v353_v27 }
  0x7d   : > { %1227 = vmatpush3.msra.mxu0 %v353_v27  ;;  %1369 = vmatpush3.msra.mxu1 %v353_v27 }
  0x7e   : > { %1228 = vmatprep.subr.mxu0 %v352_v28  ;;  %1354 = vmatprep.subr.mxu1 %v352_v28 }
  0x7f   : > { %1229 = vmatpush3.msra.mxu0 %v352_v28  ;;  %1370 = vmatpush3.msra.mxu1 %v352_v28 }
  0x80   : > { %1230 = vmatprep.subr.mxu0 %v351_v29  ;;  %1355 = vmatprep.subr.mxu1 %v351_v29 }
  0x81   : > { %1231 = vmatpush3.msra.mxu0 %v351_v29  ;;  %1371 = vmatpush3.msra.mxu1 %v351_v29 }
  0x82   : > { %1232 = vmatprep.subr.mxu0 %v350_v30  ;;  %1356 = vmatprep.subr.mxu1 %v350_v30 }
  0x83   : > { %1233 = vmatpush3.msra.mxu0 %v350_v30  ;;  %1372 = vmatpush3.msra.mxu1 %v350_v30 }
  0x84   : > { %1234 = vmatprep.subr.mxu0 %v349_v31  ;;  %1357 = vmatprep.subr.mxu1 %v349_v31 }
  0x85   : > { %1235 = vmatpush3.msra.mxu0 %v349_v31  ;;  %1373 = vmatpush3.msra.mxu1 %v349_v31 }
  0x86   : > { %1237 = vmatmul.mubr.f32.vlgmr.msra.gmra.mxu0 %v1985_v1  ;;  %1249 = vmatmul.mubr.f32.vlgmr.msra.gmra.mxu1 %v2009_v9 }
  0x87   : > { %1239 = vmatprep.mubr.f32.mxu0 %v1988_v2  ;;  %1251 = vmatprep.mubr.f32.mxu1 %v2012_v10 }
  0x8a   : > { %1240 = vmatmul.mubr.f32.gmra.mxu0 %v1991_v3  ;;  %1252 = vmatmul.mubr.f32.gmra.mxu1 %v2015_v11 }
  0x8b   : > { %1242 = vmatprep.mubr.f32.mxu0 %v1994_v4  ;;  %1254 = vmatprep.mubr.f32.mxu1 %v2018_v12 }
  0x8e   : > { %1243 = vmatmul.mubr.f32.gmra.mxu0 %v1997_v5  ;;  %1255 = vmatmul.mubr.f32.gmra.mxu1 %v2021_v13 }
  0x8f   : > { %1245 = vmatprep.mubr.f32.mxu0 %v2000_v6  ;;  %1257 = vmatprep.mubr.f32.mxu1 %v2024_v14 }
  0x92   : > { %1246 = vmatmul.mubr.f32.gmra.mxu0 %v2003_v7  ;;  %1258 = vmatmul.mubr.f32.gmra.mxu1 %v2027_v15 }
 0x146   : > { %v1238_v32 = vpop.f32.mrf.mxu0  ;;  %v1250_v33 = vpop.f32.mrf.mxu1 }
 0x147   : > { %512 = vst.msk [vmem:[#allocation2 + $0x8] sm:$0xff] %vm510_vm0, %v1238_v32  ;;  %520 = vst.msk [vmem:[#allocation2 + $0x48] sm:$0xff] %vm510_vm0, %v1250_v33 }
 0x148   : > { %v431_v34 = vpop.f32.mrf.mxu0  ;;  %v471_v35 = vpop.f32.mrf.mxu1 }
 0x149   : > { %511 = vst.msk [vmem:[#allocation2] sm:$0xff] %vm510_vm0, %v431_v34  ;;  %519 = vst.msk [vmem:[#allocation2 + $0x40] sm:$0xff] %vm510_vm0, %v471_v35 }
 0x14a   : > { %v1241_v36 = vpop.f32.mrf.mxu0  ;;  %v1253_v37 = vpop.f32.mrf.mxu1 }
 0x14b   : > { %514 = vst.msk [vmem:[#allocation2 + $0x18] sm:$0xff] %vm510_vm0, %v1241_v36  ;;  %522 = vst.msk [vmem:[#allocation2 + $0x58] sm:$0xff] %vm510_vm0, %v1253_v37 }
 0x14c   : > { %v441_v38 = vpop.f32.mrf.mxu0  ;;  %v481_v39 = vpop.f32.mrf.mxu1 }
 0x14d   : > { %513 = vst.msk [vmem:[#allocation2 + $0x10] sm:$0xff] %vm510_vm0, %v441_v38  ;;  %521 = vst.msk [vmem:[#allocation2 + $0x50] sm:$0xff] %vm510_vm0, %v481_v39 }
 0x14e   : > { %v1244_v40 = vpop.f32.mrf.mxu0  ;;  %v1256_v41 = vpop.f32.mrf.mxu1 }
 0x14f   : > { %516 = vst.msk [vmem:[#allocation2 + $0x28] sm:$0xff] %vm510_vm0, %v1244_v40  ;;  %524 = vst.msk [vmem:[#allocation2 + $0x68] sm:$0xff] %vm510_vm0, %v1256_v41 }
 0x150   : > { %v451_v42 = vpop.f32.mrf.mxu0  ;;  %v491_v43 = vpop.f32.mrf.mxu1 }
 0x151   : > { %515 = vst.msk [vmem:[#allocation2 + $0x20] sm:$0xff] %vm510_vm0, %v451_v42  ;;  %523 = vst.msk [vmem:[#allocation2 + $0x60] sm:$0xff] %vm510_vm0, %v491_v43 }
 0x152   : > { %v1247_v44 = vpop.f32.mrf.mxu0  ;;  %v1259_v45 = vpop.f32.mrf.mxu1 }
 0x153   : > { %518 = vst.msk [vmem:[#allocation2 + $0x38] sm:$0xff] %vm510_vm0, %v1247_v44  ;;  %526 = vst.msk [vmem:[#allocation2 + $0x78] sm:$0xff] %vm510_vm0, %v1259_v45 }
 0x154   : > { %v461_v46 = vpop.f32.mrf.mxu0  ;;  %v501_v47 = vpop.f32.mrf.mxu1 }
 0x155   : > { %517 = vst.msk [vmem:[#allocation2 + $0x30] sm:$0xff] %vm510_vm0, %v461_v46  ;;  %525 = vst.msk [vmem:[#allocation2 + $0x70] sm:$0xff] %vm510_vm0, %v501_v47 }
 0x156 PF: > { %v542_v48 = vld [vmem:[%s1958_s16 + $0x78] sm:$0xff]  ;;  %v541_v49 = vld [vmem:[%s1958_s16 + $0x70] sm:$0xff]  ;;  %1292 = vmatprep.mubr.f32.mxu0 %v1982_v0  ;;  %v540_v50 = vld [vmem:[%s1958_s16 + $0x68] sm:$0xff]  ;;  %vm712_vm1 = vcmask 64512   ;;  %s2334_s21 = sld [smem:[#allocation12_spill]]  ;;  %s954_s7 = sshll.u32 %s2029_s9, 4  ;;  %s2206_s7 = int_to_ptr.vmem [resolvable:$true] %s954_s7 }
 0x157   : > { %1260 = vmatprep.subr.mxu0 %v542_v48  ;;  %v539_v51 = vld [vmem:[%s1958_s16 + $0x60] sm:$0xff]  ;;  %v538_v54 = vld [vmem:[%s1958_s16 + $0x58] sm:$0xff]  ;;  %v696_v55 = vld [vmem:[#allocation2 + $0x8] sm:$0xff]  ;;  %s2335_s4 = sld [smem:[#allocation17_spill]]  ;;  %s2212_s24 = scalar_lea.sflag [#allocation5], %s317_s12 }
 0x158   : > { %1261 = vmatpush3.msra.mxu0 %v542_v48  ;;  %v711_v52 = vld [vmem:[%s1979_s15] sm:$0xff]  ;;  %v697_v56 = vld [vmem:[#allocation2 + $0x10] sm:$0xff]  ;;  %v536_v58 = vld [vmem:[%s1958_s16 + $0x48] sm:$0xff]  ;;  %s2336_s10 = sld [smem:[#allocation22_spill]]  ;;  %s1568_s28 = scalar_lea.vmem %s2206_s7, 2048 }
 0x159   : > { %1262 = vmatprep.subr.mxu0 %v541_v49  ;;  %v695_v53 = vld [vmem:[#allocation2] sm:$0xff]  ;;  %1316 = vmatprep.subr.mxu1 %v711_v52  ;;  %v537_v57 = vld [vmem:[%s1958_s16 + $0x50] sm:$0xff]  ;;  %v698_v59 = vld [vmem:[#allocation2 + $0x18] sm:$0xff]  ;;  %p1569_p11 = scmp.ne.s32.totalorder %s2206_s7, %s1568_s28 }
 0x15a   : > { %1263 = vmatpush3.msra.mxu0 %v541_v49  ;;  %1317 = vmatpush3.msra.mxu1 %v711_v52  ;;  %v699_v60 = vld [vmem:[#allocation2 + $0x20] sm:$0xff]  ;;  %v534_v62 = vld [vmem:[%s1958_s16 + $0x38] sm:$0xff]  ;;  %v700_v63 = vld [vmem:[#allocation2 + $0x28] sm:$0xff] }
 0x15b   : > { %1264 = vmatprep.subr.mxu0 %v540_v50  ;;  %1318 = vmatprep.mubr.msk.f32.mxu1 %vm712_vm1, %v695_v53  ;;  %v535_v61 = vld [vmem:[%s1958_s16 + $0x40] sm:$0xff]  ;;  %v533_v16 = vld [vmem:[%s1958_s16 + $0x30] sm:$0xff]  ;;  %v532_v17 = vld [vmem:[%s1958_s16 + $0x28] sm:$0xff] }
 0x15c   : > { %1265 = vmatpush3.msra.mxu0 %v540_v50  ;;  %1319 = vmatmul.mubr.msk.f32.vlgmr.msra.gmra.mxu1 %vm712_vm1, %v696_v55  ;;  %v701_v0 = vld [vmem:[#allocation2 + $0x30] sm:$0xff]  ;;  %v702_v18 = vld [vmem:[#allocation2 + $0x38] sm:$0xff]  ;;  %v703_v19 = vld [vmem:[#allocation2 + $0x40] sm:$0xff] }
 0x15d   : > { %1266 = vmatprep.subr.mxu0 %v539_v51  ;;  %1321 = vmatprep.mubr.msk.f32.mxu1 %vm712_vm1, %v697_v56  ;;  %v531_v20 = vld [vmem:[%s1958_s16 + $0x20] sm:$0xff]  ;;  %v530_v21 = vld [vmem:[%s1958_s16 + $0x18] sm:$0xff]  ;;  %v704_v22 = vld [vmem:[#allocation2 + $0x48] sm:$0xff]  ;;  %p2337_p8 = scmp.ne.s32.totalorder %s2335_s4, 0 }
 0x15e   : > { %1267 = vmatpush3.msra.mxu0 %v539_v51  ;;  %v705_v23 = vld [vmem:[#allocation2 + $0x50] sm:$0xff]  ;;  %v528_v25 = vld [vmem:[%s1958_s16 + $0x8] sm:$0xff]  ;;  %v706_v26 = vld [vmem:[#allocation2 + $0x58] sm:$0xff] }
 0x15f   : > { %1268 = vmatprep.subr.mxu0 %v538_v54  ;;  %v529_v24 = vld [vmem:[%s1958_s16 + $0x10] sm:$0xff]  ;;  %v707_v27 = vld [vmem:[#allocation2 + $0x60] sm:$0xff]  ;;  %v708_v29 = vld [vmem:[#allocation2 + $0x68] sm:$0xff]  ;;  %p1570_p9 = pnand %p1569_p11, %p2337_p8 }
 0x160   : > { %1269 = vmatpush3.msra.mxu0 %v538_v54  ;;  %1322 = vmatmul.mubr.msk.f32.gmra.mxu1 %vm712_vm1, %v698_v59  ;;  %v527_v28 = vld [vmem:[%s1958_s16] sm:$0xff]  ;;  %v709_v30 = vld [vmem:[#allocation2 + $0x70] sm:$0xff]  ;;  %v710_v31 = vld [vmem:[#allocation2 + $0x78] sm:$0xff]  ;;  %s1723_s16 = smov [#allocation8]  }
 0x161   : > { %1270 = vmatprep.subr.mxu0 %v537_v57  ;;  %1324 = vmatprep.mubr.msk.f32.mxu1 %vm712_vm1, %v699_v60  ;;  %p1571_p1 = pneg %p1570_p9  ;;  %s1572_s15 = sshll.u32 %s1723_s16, 4  ;;  %s1573_s15 = int_to_ptr.vmem [resolvable:$false] %s1572_s15 }
 0x162   : > { %1271 = vmatpush3.msra.mxu0 %v537_v57  ;;  %s1574_s2 = scalar_lea.vmem %s1573_s15, 4096  ;;  %p1575_p2 = scmp.lt.s32.totalorder %s2206_s7, %s1573_s15 }
 0x163   : > { %1272 = vmatprep.subr.mxu0 %v536_v58  ;;  %p1576_p4 = scmp.lt.s32.totalorder %s1574_s2, %s1568_s28 }
 0x164   : > { %1273 = vmatpush3.msra.mxu0 %v536_v58  ;;  %1325 = vmatmul.mubr.msk.f32.gmra.mxu1 %vm712_vm1, %v700_v63 }
 0x165   : > { %1274 = vmatprep.subr.mxu0 %v535_v61  ;;  %1327 = vmatprep.mubr.msk.f32.mxu1 %vm712_vm1, %v701_v0  ;;  %p1577_p5 = por %p1576_p4, %p1575_p2 }
 0x166   : > { %1275 = vmatpush3.msra.mxu0 %v535_v61 }
 0x167   : > { %1276 = vmatprep.subr.mxu0 %v534_v62  ;;  %p1578_p10 = pnand %p1577_p5, %p1571_p1 }
 0x168   : > { %1277 = vmatpush3.msra.mxu0 %v534_v62  ;;  %1328 = vmatmul.mubr.msk.f32.gmra.mxu1 %vm712_vm1, %v702_v18 }
 0x169   : > { %1278 = vmatprep.subr.mxu0 %v533_v16  ;;  %1330 = vmatprep.mubr.msk.f32.mxu1 %vm712_vm1, %v703_v19 }
 0x16a   : > { %1279 = vmatpush3.msra.mxu0 %v533_v16 }
 0x16b   : > { %1280 = vmatprep.subr.mxu0 %v532_v17 }
 0x16c   : > { %1281 = vmatpush3.msra.mxu0 %v532_v17  ;;  %1331 = vmatmul.mubr.msk.f32.gmra.mxu1 %vm712_vm1, %v704_v22 }
 0x16d   : > { %1282 = vmatprep.subr.mxu0 %v531_v20  ;;  %1333 = vmatprep.mubr.msk.f32.mxu1 %vm712_vm1, %v705_v23 }
 0x16e   : > { %1283 = vmatpush3.msra.mxu0 %v531_v20 }
 0x16f   : > { %1284 = vmatprep.subr.mxu0 %v530_v21 }
 0x170   : > { %1285 = vmatpush3.msra.mxu0 %v530_v21  ;;  %1334 = vmatmul.mubr.msk.f32.gmra.mxu1 %vm712_vm1, %v706_v26 }
 0x171   : > { %1286 = vmatprep.subr.mxu0 %v529_v24  ;;  %1336 = vmatprep.mubr.msk.f32.mxu1 %vm712_vm1, %v707_v27 }
 0x172   : > { %1287 = vmatpush3.msra.mxu0 %v529_v24 }
 0x173   : > { %1288 = vmatprep.subr.mxu0 %v528_v25 }
 0x174   : > { %1289 = vmatpush3.msra.mxu0 %v528_v25  ;;  %1337 = vmatmul.mubr.msk.f32.gmra.mxu1 %vm712_vm1, %v708_v29 }
 0x175   : > { %1290 = vmatprep.subr.mxu0 %v527_v28  ;;  %1339 = vmatprep.mubr.msk.f32.mxu1 %vm712_vm1, %v709_v30 }
 0x176   : > { %1291 = vmatpush3.msra.mxu0 %v527_v28 }
 0x177   : > { %1293 = vmatmul.mubr.f32.vlgmr.msra.gmra.mxu0 %v1985_v1 }
 0x178   : > { %1295 = vmatprep.mubr.f32.mxu0 %v1988_v2  ;;  %1340 = vmatmul.mubr.msk.f32.gmra.mxu1 %vm712_vm1, %v710_v31 }
 0x17b   : > { %1296 = vmatmul.mubr.f32.gmra.mxu0 %v1991_v3 }
 0x17c   : > { %1298 = vmatprep.mubr.f32.mxu0 %v1994_v4 }
 0x17f   : > { %1299 = vmatmul.mubr.f32.gmra.mxu0 %v1997_v5 }
 0x180   : > { %1301 = vmatprep.mubr.f32.mxu0 %v2000_v6 }
 0x183   : > { %1302 = vmatmul.mubr.f32.gmra.mxu0 %v2003_v7 }
 0x184   : > { %1304 = vmatprep.mubr.f32.mxu0 %v2006_v8  ;;  %v2166_v8 = vld [vmem:[%s323_s5] ss:$0 sm:$0xff]  ;;  %s1374_s5 = smul.u32 48, %s2334_s21 }
 0x186   : > { %s951_s17 = sadd.s32 %s1700_s27, %s1374_s5 }
 0x187   : > { %1305 = vmatmul.mubr.f32.gmra.mxu0 %v2009_v9  ;;  %s1119_s30 = sshll.u32 %s951_s17, 7 }
 0x188   : > { %1307 = vmatprep.mubr.f32.mxu0 %v2012_v10  ;;  %s2204_s8 = scalar_lea.hbm %s2336_s10, %s1119_s30 }
 0x18b   : > { %1308 = vmatmul.mubr.f32.gmra.mxu0 %v2015_v11 }
 0x18c   : > { %1310 = vmatprep.mubr.f32.mxu0 %v2018_v12 }
 0x18f   : > { %1311 = vmatmul.mubr.f32.gmra.mxu0 %v2021_v13 }
 0x190   : > { %1313 = vmatprep.mubr.f32.mxu0 %v2024_v14 }
 0x193   : > { %1314 = vmatmul.mubr.f32.gmra.mxu0 %v2027_v15 }
 0x21c   : > { %v1320_v1 = vpop.f32.mrf.mxu1 }
 0x21e   : > { %v827_v2 = vpop.f32.mrf.mxu1 }
 0x220   : > { %v1323_v3 = vpop.f32.mrf.mxu1 }
 0x222   : > { %v837_v4 = vpop.f32.mrf.mxu1 }
 0x224   : > { %v1326_v5 = vpop.f32.mrf.mxu1 }
 0x226   : > { %v847_v6 = vpop.f32.mrf.mxu1 }
 0x228   : > { %v1329_v7 = vpop.f32.mrf.mxu1 }
 0x22a   : > { %v857_v10 = vpop.f32.mrf.mxu1 }
 0x22c   : > { %v1332_v32 = vpop.f32.mrf.mxu1 }
 0x22e   : > { %v867_v39 = vpop.f32.mrf.mxu1 }
 0x230   : > { %v1335_v46 = vpop.f32.mrf.mxu1 }
 0x232   : > { %v877_v53 = vpop.f32.mrf.mxu1 }
 0x234   : > { %v1338_v60 = vpop.f32.mrf.mxu1 }
 0x236   : > { %v887_v18 = vpop.f32.mrf.mxu1 }
 0x237   : > { %v1294_v9 = vpop.f32.mrf.mxu0 }
 0x238   : > { %v622_v11 = vadd.f32 %v1294_v9, %v2166_v8  ;;  %v1341_v25 = vpop.f32.mrf.mxu1 }
 0x239   : > { %v616_v12 = vpop.f32.mrf.mxu0 }
 0x23a   : > { %v907_v13 = vadd.f32 %v1320_v1, %v622_v11  ;;  %v617_v14 = vadd.f32 %v2166_v8, %v616_v12  ;;  %v897_v31 = vpop.f32.mrf.mxu1 }
 0x23b   : > { %v1297_v15 = vpop.f32.mrf.mxu0 }
 0x23c   : > { %923 = vst [vmem:[%s2029_s9 + $0x8] sm:$0xff] %v907_v13  ;;  %v906_v33 = vadd.f32 %v827_v2, %v617_v14  ;;  %v632_v34 = vadd.f32 %v1297_v15, %v2166_v8 }
 0x23d   : > { %v626_v35 = vpop.f32.mrf.mxu0 }
 0x23e   : > { %922 = vst [vmem:[%s2029_s9] sm:$0xff] %v906_v33  ;;  %v909_v36 = vadd.f32 %v1323_v3, %v632_v34  ;;  %v627_v37 = vadd.f32 %v2166_v8, %v626_v35 }
 0x23f   : > { %v1300_v38 = vpop.f32.mrf.mxu0 }
 0x240   : > { %925 = vst [vmem:[%s2029_s9 + $0x18] sm:$0xff] %v909_v36  ;;  %v908_v40 = vadd.f32 %v837_v4, %v627_v37  ;;  %v642_v41 = vadd.f32 %v1300_v38, %v2166_v8 }
 0x241   : > { %v636_v42 = vpop.f32.mrf.mxu0 }
 0x242   : > { %924 = vst [vmem:[%s2029_s9 + $0x10] sm:$0xff] %v908_v40  ;;  %v911_v43 = vadd.f32 %v1326_v5, %v642_v41  ;;  %v637_v44 = vadd.f32 %v2166_v8, %v636_v42 }
 0x243   : > { %v1303_v45 = vpop.f32.mrf.mxu0 }
 0x244   : > { %927 = vst [vmem:[%s2029_s9 + $0x28] sm:$0xff] %v911_v43  ;;  %v910_v47 = vadd.f32 %v847_v6, %v637_v44  ;;  %v652_v48 = vadd.f32 %v1303_v45, %v2166_v8 }
 0x245   : > { %v646_v49 = vpop.f32.mrf.mxu0 }
 0x246   : > { %926 = vst [vmem:[%s2029_s9 + $0x20] sm:$0xff] %v910_v47  ;;  %v913_v50 = vadd.f32 %v1329_v7, %v652_v48  ;;  %v647_v51 = vadd.f32 %v2166_v8, %v646_v49 }
 0x247   : > { %v1306_v52 = vpop.f32.mrf.mxu0 }
 0x248   : > { %929 = vst [vmem:[%s2029_s9 + $0x38] sm:$0xff] %v913_v50  ;;  %v912_v54 = vadd.f32 %v857_v10, %v647_v51  ;;  %v662_v55 = vadd.f32 %v1306_v52, %v2166_v8 }
 0x249   : > { %v656_v56 = vpop.f32.mrf.mxu0 }
 0x24a   : > { %928 = vst [vmem:[%s2029_s9 + $0x30] sm:$0xff] %v912_v54  ;;  %v915_v57 = vadd.f32 %v1332_v32, %v662_v55  ;;  %v657_v58 = vadd.f32 %v2166_v8, %v656_v56 }
 0x24b   : > { %v1309_v59 = vpop.f32.mrf.mxu0 }
 0x24c   : > { %931 = vst [vmem:[%s2029_s9 + $0x48] sm:$0xff] %v915_v57  ;;  %v914_v61 = vadd.f32 %v867_v39, %v657_v58  ;;  %v672_v62 = vadd.f32 %v1309_v59, %v2166_v8 }
 0x24d   : > { %v666_v63 = vpop.f32.mrf.mxu0 }
 0x24e   : > { %930 = vst [vmem:[%s2029_s9 + $0x40] sm:$0xff] %v914_v61  ;;  %v917_v0 = vadd.f32 %v1335_v46, %v672_v62  ;;  %v667_v16 = vadd.f32 %v2166_v8, %v666_v63 }
 0x24f   : > { %v1312_v17 = vpop.f32.mrf.mxu0 }
 0x250   : > { %933 = vst [vmem:[%s2029_s9 + $0x58] sm:$0xff] %v917_v0  ;;  %v916_v19 = vadd.f32 %v877_v53, %v667_v16  ;;  %v682_v20 = vadd.f32 %v1312_v17, %v2166_v8 }
 0x251   : > { %v676_v21 = vpop.f32.mrf.mxu0 }
 0x252   : > { %932 = vst [vmem:[%s2029_s9 + $0x50] sm:$0xff] %v916_v19  ;;  %v919_v22 = vadd.f32 %v1338_v60, %v682_v20  ;;  %v677_v23 = vadd.f32 %v2166_v8, %v676_v21 }
 0x253   : > { %v1315_v24 = vpop.f32.mrf.mxu0 }
 0x254   : > { %935 = vst [vmem:[%s2029_s9 + $0x68] sm:$0xff] %v919_v22  ;;  %v918_v26 = vadd.f32 %v887_v18, %v677_v23  ;;  %v692_v27 = vadd.f32 %v1315_v24, %v2166_v8 }
 0x255   : > { %v686_v28 = vpop.f32.mrf.mxu0 }
 0x256   : > { %934 = vst [vmem:[%s2029_s9 + $0x60] sm:$0xff] %v918_v26  ;;  %v921_v29 = vadd.f32 %v1341_v25, %v692_v27  ;;  %v687_v30 = vadd.f32 %v2166_v8, %v686_v28 }
 0x258   : > { %937 = vst [vmem:[%s2029_s9 + $0x78] sm:$0xff] %v921_v29  ;;  %v920_v1 = vadd.f32 %v897_v31, %v687_v30 }
 0x25a   : > { %936 = vst [vmem:[%s2029_s9 + $0x70] sm:$0xff] %v920_v1 }
 0x25b   : > { %1581 = shalt.err (!%p1578_p10)
}
 0x25c   : > { %s1582_s12 = scalar_lea.hbm %s2204_s8, 2048  ;;  %s1586_s5 = scalar_lea.hbm %s2336_s10, 24576 }
 0x25d   : > { %p1583_p12 = scmp.ne.s32.totalorder %s2204_s8, %s1582_s12  ;;  %p1587_p0 = scmp.lt.s32.totalorder %s2204_s8, %s2336_s10 }
 0x25e   : > { %p1588_p6 = scmp.lt.s32.totalorder %s1586_s5, %s1582_s12 }
 0x25f   : > { %p1584_p3 = pnand %p1583_p12, %p2337_p8 }
 0x260   : > { %p1589_p7 = por %p1588_p6, %p1587_p0 }
 0x261   : > { %p1585_p13 = pneg %p1584_p3 }
 0x263   : > { %p1590_p11 = pnand %p1589_p7, %p1585_p13 }
 0x265   : > { %1593 = shalt.err (!%p1590_p11)
}
 0x266   : > { %s1724_s27 = smov 128   ;;  %s1725_s14 = smov 384  }
 0x267   : > { %s1726_s28 = smov 8  }
 0x268   : > { %1379 = dma.vmem_to_hbm [thread:$0]  (%p2337_p8), %s2206_s7, 2048, %s2204_s8, %s2212_s24, %s1724_s27, %s1725_s14, %s1726_s28  }
 0x269 PF: > { %p1393_p9 = scmp.ge.s32.totalorder %s1716_s6, 2  ;;  %s969_s16 = sand.u32 1, %s1664_s18  }
 0x26a   : > { %p2338_p1 = scmp.ne.s32.totalorder %s2325_s11, 0  ;;  %s970_s15 = scalar_lea.sflag [#allocation5], %s969_s16 }
 0x26c   : > { %p1389_p2 = pnand %p1393_p9, %p2338_p1 }
 0x26e   : > { %p1390_p4 = pneg %p1389_p2 }
 0x270   : > { %1659 = dma.done.wait (%p1390_p4), %s970_s15, 2048  }
 0x271   : > { %1661 = vsyncadd (%p1390_p4), %s970_s15, 4294965248  ;;  %s24_s6 = sadd.s32 1, %s1716_s6   ;;  %s2340_s4 = sld [smem:[#allocation16_spill]] }
 0x272   : > { %p2240_p5 = scmp.ge.s32.totalorder %s24_s6, 14   ;;  %s2341_s28 = sld [smem:[#allocation13_spill]] }
 0x273   : > { %s2342_s11 = sld [smem:[#allocation14_spill]]  ;;  %s2344_s18 = smov %s1668_s19 }
 0x274   : > { %s2343_s30 = sld [smem:[#allocation15_spill]]  ;;  %s2345_s19 = smov %s1672_s20 }
 0x275   : > { %s2346_s20 = smov %s1923_s0  ;;  %s2347_s21 = smov %s1680_s22 }
 0x276   : > { %s2348_s22 = smov %s1684_s23  ;;  %s2350_s24 = smov %s1692_s25 }
 0x277   : > { %s2349_s23 = smov %s2340_s4  ;;  %s2351_s25 = smov %s1696_s26 }
 0x278   : > { %s2352_s26 = smov %s1920_s3  ;;  %s2353_s27 = smov %s1708_s29 }
 0x279   : > { %s2354_s29 = smov %s2342_s11  ;;  %23 = sbr.rel (!%p2240_p5) target bundleno = 18 (0x12), region = 108 }
 0x27e   :  { %975 = vsyncpa [#allocation4], 1 }
 0x27f   :  { %977 = vsyncpa [#allocation4 + $0x1], 1 }
 0x280   :  { %978 = vsyncpa [#allocation7], 1 }
 0x281   :  { %980 = vsyncpa [#allocation7 + $0x1], 1 }
 0x282   :  { %981 = vsyncpa [#allocation5], 1 }
 0x283   :  { %983 = vsyncpa [#allocation5 + $0x1], 1 }

</bundles_post_ra>
